<compile_context>
chip_gen: v5e
topology: v5e:2x2
jax: 0.10.0
libtpu: 0.0.40
codegen_flags: <defaults>
</compile_context>

<pallas_src>
import jax
import jax.numpy as jnp
from jax import lax
from jax.experimental import pallas as pl
from jax.experimental.pallas import tpu as pltpu

_BF16 = jnp.bfloat16
_F32 = jnp.float32


# ------------------------ constant-slab construction -------------------------

def _tap_cat(w, w_in, w_out, stride, pad, in_lanes=None):
    """Stacked tap matrix T_cat: (kh * in_lanes, w_out*cout), f32.

    T_cat[i*in_lanes + wi*cin + ci, wo*cout + co] = w[i, j, ci, co] where
    wi == stride*wo + j - pad (taps falling in the zero padding are dropped).
    Multiplying the in-kernel tap LHS [tap0 | tap1 | tap2] by T_cat performs
    the whole 3x3 conv as a single matmul.
    """
    kh, kw, cin, cout = w.shape
    if in_lanes is None:
        in_lanes = w_in * cin
    wi = jnp.arange(w_in)
    wo = jnp.arange(w_out)
    jj = jnp.arange(kw)
    sel = (wi[None, :, None] ==
           stride * wo[None, None, :] + jj[:, None, None] - pad).astype(_F32)
    t = jnp.einsum('jxw,ijcd->ixcwd', sel, w.astype(_F32))
    t = t.reshape(kh, w_in * cin, w_out * cout)
    if in_lanes > w_in * cin:
        t = jnp.pad(t, ((0, 0), (0, in_lanes - w_in * cin), (0, 0)))
    return t.reshape(kh * in_lanes, w_out * cout)


def _bias_row(b, w_out, lanes):
    row = jnp.tile(b.astype(_F32), w_out)
    return jnp.zeros((1, lanes), _F32).at[0, :row.shape[0]].set(row)


def _pack_constants(params, n, cin, h, w, num_frames):
    c1 = params["enc_b1"].shape[0]
    c2 = params["enc_b2"].shape[0]
    dc = params["dec_squeeze_b"].shape[0]
    cf = 6 * num_frames

    h1, w1 = (h - 1) // 2 + 1, (w - 1) // 2 + 1      # enc conv1: 3x3 s2 p1
    h2, w2 = (h1 - 1) // 2 + 1, (w1 - 1) // 2 + 1    # enc conv2: 3x3 s2 p1

    lanes = w1 * c1
    assert lanes % 128 == 0 and lanes == w2 * c2 == w2 * dc, (
        "packing assumes a common lane-dense feature width")
    assert cf <= lanes
    assert h % 2 == 0 and h1 % 2 == 0, "stride-2 row tricks need even heights"

    xlanes = pl.cdiv(w * cin, 128) * 128              # lane-pad the input width

    # --- bf16 weight slab: five conv tap matrices stacked along rows --------
    secs = [
        _tap_cat(params["enc_w1"], w, w1, 2, 1, in_lanes=xlanes),
        _tap_cat(params["enc_w2"], w1, w2, 2, 1),
        jnp.kron(jnp.eye(w2, dtype=_F32),
                 params["dec_squeeze_w"][0, 0].astype(_F32)),
        _tap_cat(params["dec_p0_w"], w2, w2, 1, 1),
        _tap_cat(params["dec_p1_w"], w2, w2, 1, 1),
    ]
    offs, blocks, rows = [], [], 0
    for s in secs:
        gap = (-rows) % 16                            # keep bf16 tile alignment
        if gap:
            blocks.append(jnp.zeros((gap, lanes), _F32))
            rows += gap
        offs.append(rows)
        blocks.append(s)
        rows += s.shape[0]
    gap = (-rows) % 16
    if gap:
        blocks.append(jnp.zeros((gap, lanes), _F32))
        rows += gap
    w_slab = jnp.concatenate(blocks, axis=0).astype(_BF16)

    # --- f32 slab: 6 bias rows (+2 pad rows) then the final tap matrix ------
    f_slab = jnp.concatenate([
        _bias_row(params["enc_b1"], w1, lanes),
        _bias_row(params["enc_b2"], w2, lanes),
        _bias_row(params["dec_squeeze_b"], w2, lanes),
        _bias_row(params["dec_p0_b"], w2, lanes),
        _bias_row(params["dec_p1_b"], w2, lanes),
        _bias_row(0.01 * params["dec_p2_b"].astype(_F32), 1, lanes),
        jnp.zeros((2, lanes), _F32),
        jnp.zeros((w2 * dc, lanes), _F32).at[:, :cf].set(
            jnp.tile(params["dec_p2_w"][0, 0].astype(_F32), (w2, 1))),
    ], axis=0)

    dims = dict(n=n, cin=cin, h=h, w=w, c1=c1, c2=c2, dc=dc, cf=cf,
                h1=h1, w1=w1, h2=h2, w2=w2, lanes=lanes, xlanes=xlanes,
                ksz=[s.shape[0] for s in secs], offs=offs)
    return w_slab, f_slab, dims


# ----------------------------- fused forward ----------------------------------

def make_many_pose_net(params, *, n, cin, h, w, num_frames=2):
    """Builds packed constant slabs once; returns a jitted forward(x_nchw)."""
    w_slab, f_slab, d = _pack_constants(params, n, cin, h, w, num_frames)

    h1, h2, w2 = d["h1"], d["h2"], d["w2"]
    lanes, xlanes, cf, dc = d["lanes"], d["xlanes"], d["cf"], d["dc"]
    m1, m2 = n * h1, n * h2
    out_rows = pl.cdiv(n, 8) * 8
    mean_scale = 0.01 / (h2 * w2)
    off_t1, off_t2, off_tsq, off_tp0, off_tp1 = d["offs"]
    k1, k2, ksq, kp0, kp1 = d["ksz"]

    def _top_mask(m, hh):
        # True on rows where ho == 0 (the zero-pad row above).
        r = lax.broadcasted_iota(jnp.int32, (m, 1), 0)
        msk = r == 0
        for b in range(1, n):
            msk = jnp.logical_or(msk, r == b * hh)
        return msk

    def _bot_mask(m, hh):
        # True on rows where ho == hh - 1 (the zero-pad row below).
        r = lax.broadcasted_iota(jnp.int32, (m, 1), 0)
        msk = r == hh - 1
        for b in range(1, n):
            msk = jnp.logical_or(msk, r == b * hh + hh - 1)
        return msk

    def kernel(x_ref, w_ref, f_ref, o_ref, y1_ref):
        def conv_mm(lhs, w_off, w_rows, bias_row, relu=True):
            y = jnp.dot(lhs.astype(_BF16), w_ref[w_off:w_off + w_rows, :],
                        preferred_element_type=_F32)
            y = y + f_ref[bias_row:bias_row + 1, :]
            return jnp.maximum(y, 0.0) if relu else y

        # -- encoder conv1: 3x3, stride 2, pad 1 (taps via strided ref loads) --
        mid = x_ref[pl.ds(0, m1, stride=2), :]                   # rows 2*ho
        low = x_ref[pl.ds(1, m1, stride=2), :]                   # rows 2*ho + 1
        up = jnp.where(_top_mask(m1, h1), 0.0,
                       pltpu.roll(low, shift=1, axis=0))         # rows 2*ho - 1
        y1 = conv_mm(jnp.concatenate([up, mid, low], axis=1), off_t1, k1, 0)

        # -- encoder conv2: 3x3, stride 2, pad 1 (bounce through VMEM scratch) --
        y1_ref[...] = y1
        mid = y1_ref[pl.ds(0, m2, stride=2), :]
        low = y1_ref[pl.ds(1, m2, stride=2), :]
        up = jnp.where(_top_mask(m2, h2), 0.0, pltpu.roll(low, shift=1, axis=0))
        y = conv_mm(jnp.concatenate([up, mid, low], axis=1), off_t2, k2, 1)

        # -- decoder squeeze 1x1 + relu ----------------------------------------
        y = conv_mm(y, off_tsq, ksq, 2)

        # -- decoder 3x3 stride-1 pad-1 convs (p0, p1) -------------------------
        def conv_s1(y, w_off, w_rows, bias_row):
            up = jnp.where(_top_mask(m2, h2), 0.0,
                           pltpu.roll(y, shift=1, axis=0))        # rows ho - 1
            dn = jnp.where(_bot_mask(m2, h2), 0.0,
                           pltpu.roll(y, shift=m2 - 1, axis=0))   # rows ho + 1
            return conv_mm(jnp.concatenate([up, y, dn], axis=1),
                           w_off, w_rows, bias_row)

        y = conv_s1(y, off_tp0, kp0, 3)
        y = conv_s1(y, off_tp1, kp1, 4)

        # -- final 1x1 conv + mean over (H, W) + *0.01 : all f32 ---------------
        pooled = jnp.concatenate(
            [jnp.sum(y[b * h2:(b + 1) * h2, :], axis=0, keepdims=True)
             for b in range(n)], axis=0)                          # (n, lanes)
        tfin = f_ref[8:8 + w2 * dc, :]                            # f32 weights
        pose = jnp.dot(pooled, tfin, preferred_element_type=_F32) * mean_scale
        pose = pose + f_ref[5:6, :]                               # 0.01 * bias
        if out_rows > n:
            pose = jnp.concatenate(
                [pose, jnp.zeros((out_rows - n, lanes), _F32)], axis=0)
        o_ref[...] = pose                                         # dense store

    pallas_fwd = pl.pallas_call(
        kernel,
        out_shape=jax.ShapeDtypeStruct((out_rows, lanes), _F32),
        in_specs=[pl.BlockSpec(memory_space=pltpu.MemorySpace.VMEM)] * 3,
        out_specs=pl.BlockSpec(memory_space=pltpu.MemorySpace.VMEM),
        scratch_shapes=[pltpu.VMEM((m1, lanes), _F32)],
    )

    @jax.jit
    def _fwd(w_slab, f_slab, x_nchw):
        # NCHW -> stacked (N*H, W*Cin) matrix layout, lane-padded to 128.
        x = jnp.transpose(x_nchw, (0, 2, 3, 1)).reshape(n * h, w * cin)
        if xlanes > w * cin:
            x = jnp.pad(x, ((0, 0), (0, xlanes - w * cin)))
        pose = pallas_fwd(x.astype(_F32), w_slab, f_slab)
        out = pose[:n, :cf].reshape(-1, num_frames, 1, 6)
        return out[..., :3], out[..., 3:]

    return lambda x_nchw: _fwd(w_slab, f_slab, x_nchw)


# --------------------------------- params -------------------------------------

def init_params(key, cin=6, c1=16, c2=32, dec_c=32, num_frames=2):
    ks = jax.random.split(key, 12)

    def wgt(k, shape, scale=0.1):
        return scale * jax.random.normal(k, shape, dtype=_F32)

    return {
        # pose_encoder (small synthetic stand-in; features[-1] has c2 channels)
        "enc_w1": wgt(ks[0], (3, 3, cin, c1)),
        "enc_b1": 0.01 * jax.random.normal(ks[1], (c1,), _F32),
        "enc_w2": wgt(ks[2], (3, 3, c1, c2)),
        "enc_b2": 0.01 * jax.random.normal(ks[3], (c2,), _F32),
        # pose_decoder (manydepth PoseDecoder, width reduced 256 -> dec_c)
        "dec_squeeze_w": wgt(ks[4], (1, 1, c2, dec_c)),
        "dec_squeeze_b": 0.01 * jax.random.normal(ks[5], (dec_c,), _F32),
        "dec_p0_w": wgt(ks[6], (3, 3, 1 * dec_c, dec_c)),   # num_input_features=1
        "dec_p0_b": 0.01 * jax.random.normal(ks[7], (dec_c,), _F32),
        "dec_p1_w": wgt(ks[8], (3, 3, dec_c, dec_c)),
        "dec_p1_b": 0.01 * jax.random.normal(ks[9], (dec_c,), _F32),
        "dec_p2_w": wgt(ks[10], (1, 1, dec_c, 6 * num_frames)),
        "dec_p2_b": 0.01 * jax.random.normal(ks[11], (6 * num_frames,), _F32),
    }


# ----------------------------- pure-JAX reference ------------------------------

def reference_forward(params, x_nchw, num_frames=2):
    dn = ('NHWC', 'HWIO', 'NHWC')
    x = jnp.transpose(x_nchw, (0, 2, 3, 1)).astype(_F32)

    def conv3x3(x, wk, b, stride):
        y = lax.conv_general_dilated(x, wk.astype(_F32), (stride, stride),
                                     [(1, 1), (1, 1)], dimension_numbers=dn)
        return jax.nn.relu(y + b)

    y = conv3x3(x, params["enc_w1"], params["enc_b1"], 2)
    y = conv3x3(y, params["enc_w2"], params["enc_b2"], 2)
    y = jax.nn.relu(jnp.einsum('nhwc,cd->nhwd', y, params["dec_squeeze_w"][0, 0])
                    + params["dec_squeeze_b"])
    y = conv3x3(y, params["dec_p0_w"], params["dec_p0_b"], 1)
    y = conv3x3(y, params["dec_p1_w"], params["dec_p1_b"], 1)
    out = (jnp.einsum('nhwc,cd->nhwd', y, params["dec_p2_w"][0, 0])
           + params["dec_p2_b"])
    pose = 0.01 * jnp.mean(out, axis=(1, 2))
    pose = pose.reshape(-1, num_frames, 1, 6)
    return pose[..., :3], pose[..., 3:]


# ----------------------------------- main --------------------------------------

if __name__ == "__main__":
    key = jax.random.PRNGKey(0)
    k_in, k_par = jax.random.split(key)

    # x: pair of RGB frames concatenated channel-wise -> 6 channels (NCHW).
    x = jax.random.normal(k_in, (2, 6, 16, 16), dtype=jnp.float32)
    params = init_params(k_par)

    forward = make_many_pose_net(params, n=2, cin=6, h=16, w=16, num_frames=2)
    axisangle, translation = forward(x)
    jax.block_until_ready((axisangle, translation))

    assert axisangle.shape == (2, 2, 1, 3), axisangle.shape
    assert translation.shape == (2, 2, 1, 3), translation.shape
    assert bool(jnp.all(jnp.isfinite(axisangle)))
    assert bool(jnp.all(jnp.isfinite(translation)))

    # Cross-check against a pure-JAX f32 reference of the same network.
    ref_ax, ref_tr = reference_forward(params, x, num_frames=2)
    err = max(float(jnp.max(jnp.abs(axisangle - ref_ax))),
              float(jnp.max(jnp.abs(translation - ref_tr))))
    assert err < 2e-4, f"kernel/reference mismatch: max abs err {err}"

    print("KERNEL_OK")
</pallas_src>

<mosaic_0001>
module attributes {stable_mosaic.version = 11 : i64} {
  func.func @kernel(%arg0: memref<32x128xf32, #tpu.memory_space<vmem>>, %arg1: memref<1664x128xbf16, #tpu.memory_space<vmem>>, %arg2: memref<136x128xf32, #tpu.memory_space<vmem>>, %arg3: memref<8x128xf32, #tpu.memory_space<vmem>>, %arg4: memref<16x128xf32, #tpu.memory_space<vmem>>) attributes {dimension_semantics = [], scalar_prefetch = 0 : i64, scratch_operands = 1 : i64, tpu.core_type = #tpu.core_type<tc>} {
    %c0 = arith.constant 0 : index
    %c0_0 = arith.constant 0 : index
    %0 = tpu.strided_load %arg0[%c0, %c0_0] {strides = array<i32: 2, 1>} : memref<32x128xf32, #tpu.memory_space<vmem>>, vector<16x128xf32>
    %c1 = arith.constant 1 : index
    %c0_1 = arith.constant 0 : index
    %1 = tpu.strided_load %arg0[%c1, %c0_1] {strides = array<i32: 2, 1>} : memref<32x128xf32, #tpu.memory_space<vmem>>, vector<16x128xf32>
    %2 = tpu.iota {dimensions = array<i32: 0>} : vector<16x1xi32>
    %c0_i32 = arith.constant 0 : i32
    %3 = vector.broadcast %c0_i32 : i32 to vector<16x1xi32>
    %4 = arith.cmpi eq, %2, %3 : vector<16x1xi32>
    %c8_i32 = arith.constant 8 : i32
    %5 = vector.broadcast %c8_i32 : i32 to vector<16x1xi32>
    %6 = arith.cmpi eq, %2, %5 : vector<16x1xi32>
    %7 = arith.ori %4, %6 : vector<16x1xi1>
    %c1_i32 = arith.constant 1 : i32
    %8 = tpu.dynamic_rotate %1 by %c1_i32 dim 0 : vector<16x128xf32>, i32 -> vector<16x128xf32>
    %cst = arith.constant 0.000000e+00 : f32
    %9 = vector.shape_cast %7 : vector<16x1xi1> to vector<16x1xi1>
    %10 = vector.broadcast %9 : vector<16x1xi1> to vector<16x128xi1>
    %11 = vector.broadcast %cst : f32 to vector<16x128xf32>
    %12 = arith.select %10, %11, %8 : vector<16x128xi1>, vector<16x128xf32>
    %13 = tpu.concatenate %12, %0, %1 in 1 : vector<16x128xf32>, vector<16x128xf32>, vector<16x128xf32> -> vector<16x384xf32>
    %14 = arith.truncf %13 : vector<16x384xf32> to vector<16x384xbf16>
    %c0_2 = arith.constant 0 : index
    %c0_3 = arith.constant 0 : index
    %15 = vector.load %arg1[%c0_2, %c0_3] : memref<1664x128xbf16, #tpu.memory_space<vmem>>, vector<384x128xbf16>
    %cst_4 = arith.constant dense<0.000000e+00> : vector<16x128xf32>
    %16 = tpu.matmul %14, %15, %cst_4 {dimension_numbers = #tpu.dot_dimension_numbers<[1], [0], [0], [1], [0, 0, 1, 1], [], []>} : vector<16x384xbf16>, vector<384x128xbf16>, vector<16x128xf32> -> vector<16x128xf32>
    %c0_5 = arith.constant 0 : index
    %c0_6 = arith.constant 0 : index
    %17 = vector.load %arg2[%c0_5, %c0_6] : memref<136x128xf32, #tpu.memory_space<vmem>>, vector<1x128xf32>
    %18 = vector.broadcast %17 : vector<1x128xf32> to vector<16x128xf32>
    %19 = arith.addf %16, %18 : vector<16x128xf32>
    %cst_7 = arith.constant 0.000000e+00 : f32
    %20 = vector.broadcast %cst_7 : f32 to vector<16x128xf32>
    %21 = arith.maximumf %19, %20 : vector<16x128xf32>
    %c0_8 = arith.constant 0 : index
    %c0_9 = arith.constant 0 : index
    %22 = vector.load %arg4[%c0_8, %c0_9] : memref<16x128xf32, #tpu.memory_space<vmem>>, vector<16x128xf32>
    tpu.vector_store %arg4[%c0_8, %c0_9], %21 {strides = array<i32>} : memref<16x128xf32, #tpu.memory_space<vmem>>, vector<16x128xf32>,
    %c0_10 = arith.constant 0 : index
    %c0_11 = arith.constant 0 : index
    %23 = tpu.strided_load %arg4[%c0_10, %c0_11] {strides = array<i32: 2, 1>} : memref<16x128xf32, #tpu.memory_space<vmem>>, vector<8x128xf32>
    %c1_12 = arith.constant 1 : index
    %c0_13 = arith.constant 0 : index
    %24 = tpu.strided_load %arg4[%c1_12, %c0_13] {strides = array<i32: 2, 1>} : memref<16x128xf32, #tpu.memory_space<vmem>>, vector<8x128xf32>
    %25 = tpu.iota {dimensions = array<i32: 0>} : vector<8x1xi32>
    %c0_i32_14 = arith.constant 0 : i32
    %26 = vector.broadcast %c0_i32_14 : i32 to vector<8x1xi32>
    %27 = arith.cmpi eq, %25, %26 : vector<8x1xi32>
    %c4_i32 = arith.constant 4 : i32
    %28 = vector.broadcast %c4_i32 : i32 to vector<8x1xi32>
    %29 = arith.cmpi eq, %25, %28 : vector<8x1xi32>
    %30 = arith.ori %27, %29 : vector<8x1xi1>
    %c1_i32_15 = arith.constant 1 : i32
    %31 = tpu.dynamic_rotate %24 by %c1_i32_15 dim 0 : vector<8x128xf32>, i32 -> vector<8x128xf32>
    %cst_16 = arith.constant 0.000000e+00 : f32
    %32 = vector.shape_cast %30 : vector<8x1xi1> to vector<8x1xi1>
    %33 = vector.broadcast %32 : vector<8x1xi1> to vector<8x128xi1>
    %34 = vector.broadcast %cst_16 : f32 to vector<8x128xf32>
    %35 = arith.select %33, %34, %31 : vector<8x128xi1>, vector<8x128xf32>
    %36 = tpu.concatenate %35, %23, %24 in 1 : vector<8x128xf32>, vector<8x128xf32>, vector<8x128xf32> -> vector<8x384xf32>
    %37 = arith.truncf %36 : vector<8x384xf32> to vector<8x384xbf16>
    %c384 = arith.constant 384 : index
    %c0_17 = arith.constant 0 : index
    %38 = vector.load %arg1[%c384, %c0_17] : memref<1664x128xbf16, #tpu.memory_space<vmem>>, vector<384x128xbf16>
    %cst_18 = arith.constant dense<0.000000e+00> : vector<8x128xf32>
    %39 = tpu.matmul %37, %38, %cst_18 {dimension_numbers = #tpu.dot_dimension_numbers<[1], [0], [0], [1], [0, 0, 1, 1], [], []>} : vector<8x384xbf16>, vector<384x128xbf16>, vector<8x128xf32> -> vector<8x128xf32>
    %c1_19 = arith.constant 1 : index
    %c0_20 = arith.constant 0 : index
    %40 = vector.load %arg2[%c1_19, %c0_20] : memref<136x128xf32, #tpu.memory_space<vmem>>, vector<1x128xf32>
    %41 = vector.broadcast %40 : vector<1x128xf32> to vector<8x128xf32>
    %42 = arith.addf %39, %41 : vector<8x128xf32>
    %cst_21 = arith.constant 0.000000e+00 : f32
    %43 = vector.broadcast %cst_21 : f32 to vector<8x128xf32>
    %44 = arith.maximumf %42, %43 : vector<8x128xf32>
    %45 = arith.truncf %44 : vector<8x128xf32> to vector<8x128xbf16>
    %c768 = arith.constant 768 : index
    %c0_22 = arith.constant 0 : index
    %46 = vector.load %arg1[%c768, %c0_22] : memref<1664x128xbf16, #tpu.memory_space<vmem>>, vector<128x128xbf16>
    %cst_23 = arith.constant dense<0.000000e+00> : vector<8x128xf32>
    %47 = tpu.matmul %45, %46, %cst_23 {dimension_numbers = #tpu.dot_dimension_numbers<[1], [0], [0], [1], [0, 0, 1, 1], [], []>} : vector<8x128xbf16>, vector<128x128xbf16>, vector<8x128xf32> -> vector<8x128xf32>
    %c2 = arith.constant 2 : index
    %c0_24 = arith.constant 0 : index
    %48 = vector.load %arg2[%c2, %c0_24] : memref<136x128xf32, #tpu.memory_space<vmem>>, vector<1x128xf32>
    %49 = vector.broadcast %48 : vector<1x128xf32> to vector<8x128xf32>
    %50 = arith.addf %47, %49 : vector<8x128xf32>
    %cst_25 = arith.constant 0.000000e+00 : f32
    %51 = vector.broadcast %cst_25 : f32 to vector<8x128xf32>
    %52 = arith.maximumf %50, %51 : vector<8x128xf32>
    %53 = tpu.iota {dimensions = array<i32: 0>} : vector<8x1xi32>
    %c0_i32_26 = arith.constant 0 : i32
    %54 = vector.broadcast %c0_i32_26 : i32 to vector<8x1xi32>
    %55 = arith.cmpi eq, %53, %54 : vector<8x1xi32>
    %c4_i32_27 = arith.constant 4 : i32
    %56 = vector.broadcast %c4_i32_27 : i32 to vector<8x1xi32>
    %57 = arith.cmpi eq, %53, %56 : vector<8x1xi32>
    %58 = arith.ori %55, %57 : vector<8x1xi1>
    %c1_i32_28 = arith.constant 1 : i32
    %59 = tpu.dynamic_rotate %52 by %c1_i32_28 dim 0 : vector<8x128xf32>, i32 -> vector<8x128xf32>
    %cst_29 = arith.constant 0.000000e+00 : f32
    %60 = vector.shape_cast %58 : vector<8x1xi1> to vector<8x1xi1>
    %61 = vector.broadcast %60 : vector<8x1xi1> to vector<8x128xi1>
    %62 = vector.broadcast %cst_29 : f32 to vector<8x128xf32>
    %63 = arith.select %61, %62, %59 : vector<8x128xi1>, vector<8x128xf32>
    %64 = tpu.iota {dimensions = array<i32: 0>} : vector<8x1xi32>
    %c3_i32 = arith.constant 3 : i32
    %65 = vector.broadcast %c3_i32 : i32 to vector<8x1xi32>
    %66 = arith.cmpi eq, %64, %65 : vector<8x1xi32>
    %c7_i32 = arith.constant 7 : i32
    %67 = vector.broadcast %c7_i32 : i32 to vector<8x1xi32>
    %68 = arith.cmpi eq, %64, %67 : vector<8x1xi32>
    %69 = arith.ori %66, %68 : vector<8x1xi1>
    %c7_i32_30 = arith.constant 7 : i32
    %70 = tpu.dynamic_rotate %52 by %c7_i32_30 dim 0 : vector<8x128xf32>, i32 -> vector<8x128xf32>
    %cst_31 = arith.constant 0.000000e+00 : f32
    %71 = vector.shape_cast %69 : vector<8x1xi1> to vector<8x1xi1>
    %72 = vector.broadcast %71 : vector<8x1xi1> to vector<8x128xi1>
    %73 = vector.broadcast %cst_31 : f32 to vector<8x128xf32>
    %74 = arith.select %72, %73, %70 : vector<8x128xi1>, vector<8x128xf32>
    %75 = tpu.concatenate %63, %52, %74 in 1 : vector<8x128xf32>, vector<8x128xf32>, vector<8x128xf32> -> vector<8x384xf32>
    %76 = arith.truncf %75 : vector<8x384xf32> to vector<8x384xbf16>
    %c896 = arith.constant 896 : index
    %c0_32 = arith.constant 0 : index
    %77 = vector.load %arg1[%c896, %c0_32] : memref<1664x128xbf16, #tpu.memory_space<vmem>>, vector<384x128xbf16>
    %cst_33 = arith.constant dense<0.000000e+00> : vector<8x128xf32>
    %78 = tpu.matmul %76, %77, %cst_33 {dimension_numbers = #tpu.dot_dimension_numbers<[1], [0], [0], [1], [0, 0, 1, 1], [], []>} : vector<8x384xbf16>, vector<384x128xbf16>, vector<8x128xf32> -> vector<8x128xf32>
    %c3 = arith.constant 3 : index
    %c0_34 = arith.constant 0 : index
    %79 = vector.load %arg2[%c3, %c0_34] : memref<136x128xf32, #tpu.memory_space<vmem>>, vector<1x128xf32>
    %80 = vector.broadcast %79 : vector<1x128xf32> to vector<8x128xf32>
    %81 = arith.addf %78, %80 : vector<8x128xf32>
    %cst_35 = arith.constant 0.000000e+00 : f32
    %82 = vector.broadcast %cst_35 : f32 to vector<8x128xf32>
    %83 = arith.maximumf %81, %82 : vector<8x128xf32>
    %84 = tpu.iota {dimensions = array<i32: 0>} : vector<8x1xi32>
    %c0_i32_36 = arith.constant 0 : i32
    %85 = vector.broadcast %c0_i32_36 : i32 to vector<8x1xi32>
    %86 = arith.cmpi eq, %84, %85 : vector<8x1xi32>
    %c4_i32_37 = arith.constant 4 : i32
    %87 = vector.broadcast %c4_i32_37 : i32 to vector<8x1xi32>
    %88 = arith.cmpi eq, %84, %87 : vector<8x1xi32>
    %89 = arith.ori %86, %88 : vector<8x1xi1>
    %c1_i32_38 = arith.constant 1 : i32
    %90 = tpu.dynamic_rotate %83 by %c1_i32_38 dim 0 : vector<8x128xf32>, i32 -> vector<8x128xf32>
    %cst_39 = arith.constant 0.000000e+00 : f32
    %91 = vector.shape_cast %89 : vector<8x1xi1> to vector<8x1xi1>
    %92 = vector.broadcast %91 : vector<8x1xi1> to vector<8x128xi1>
    %93 = vector.broadcast %cst_39 : f32 to vector<8x128xf32>
    %94 = arith.select %92, %93, %90 : vector<8x128xi1>, vector<8x128xf32>
    %95 = tpu.iota {dimensions = array<i32: 0>} : vector<8x1xi32>
    %c3_i32_40 = arith.constant 3 : i32
    %96 = vector.broadcast %c3_i32_40 : i32 to vector<8x1xi32>
    %97 = arith.cmpi eq, %95, %96 : vector<8x1xi32>
    %c7_i32_41 = arith.constant 7 : i32
    %98 = vector.broadcast %c7_i32_41 : i32 to vector<8x1xi32>
    %99 = arith.cmpi eq, %95, %98 : vector<8x1xi32>
    %100 = arith.ori %97, %99 : vector<8x1xi1>
    %c7_i32_42 = arith.constant 7 : i32
    %101 = tpu.dynamic_rotate %83 by %c7_i32_42 dim 0 : vector<8x128xf32>, i32 -> vector<8x128xf32>
    %cst_43 = arith.constant 0.000000e+00 : f32
    %102 = vector.shape_cast %100 : vector<8x1xi1> to vector<8x1xi1>
    %103 = vector.broadcast %102 : vector<8x1xi1> to vector<8x128xi1>
    %104 = vector.broadcast %cst_43 : f32 to vector<8x128xf32>
    %105 = arith.select %103, %104, %101 : vector<8x128xi1>, vector<8x128xf32>
    %106 = tpu.concatenate %94, %83, %105 in 1 : vector<8x128xf32>, vector<8x128xf32>, vector<8x128xf32> -> vector<8x384xf32>
    %107 = arith.truncf %106 : vector<8x384xf32> to vector<8x384xbf16>
    %c1280 = arith.constant 1280 : index
    %c0_44 = arith.constant 0 : index
    %108 = vector.load %arg1[%c1280, %c0_44] : memref<1664x128xbf16, #tpu.memory_space<vmem>>, vector<384x128xbf16>
    %cst_45 = arith.constant dense<0.000000e+00> : vector<8x128xf32>
    %109 = tpu.matmul %107, %108, %cst_45 {dimension_numbers = #tpu.dot_dimension_numbers<[1], [0], [0], [1], [0, 0, 1, 1], [], []>} : vector<8x384xbf16>, vector<384x128xbf16>, vector<8x128xf32> -> vector<8x128xf32>
    %c4 = arith.constant 4 : index
    %c0_46 = arith.constant 0 : index
    %110 = vector.load %arg2[%c4, %c0_46] : memref<136x128xf32, #tpu.memory_space<vmem>>, vector<1x128xf32>
    %111 = vector.broadcast %110 : vector<1x128xf32> to vector<8x128xf32>
    %112 = arith.addf %109, %111 : vector<8x128xf32>
    %cst_47 = arith.constant 0.000000e+00 : f32
    %113 = vector.broadcast %cst_47 : f32 to vector<8x128xf32>
    %114 = arith.maximumf %112, %113 : vector<8x128xf32>
    %115 = vector.extract_strided_slice %114 {offsets = [0, 0], sizes = [4, 128], strides = [1, 1]} : vector<8x128xf32> to vector<4x128xf32>
    %cst_48 = arith.constant dense<0.000000e+00> : vector<128xf32>
    %116 = vector.multi_reduction <add>, %115, %cst_48 [0] : vector<4x128xf32> to vector<128xf32>
    %117 = vector.shape_cast %116 : vector<128xf32> to vector<1x128xf32>
    %118 = vector.extract_strided_slice %114 {offsets = [4, 0], sizes = [4, 128], strides = [1, 1]} : vector<8x128xf32> to vector<4x128xf32>
    %cst_49 = arith.constant dense<0.000000e+00> : vector<128xf32>
    %119 = vector.multi_reduction <add>, %118, %cst_49 [0] : vector<4x128xf32> to vector<128xf32>
    %120 = vector.shape_cast %119 : vector<128xf32> to vector<1x128xf32>
    %121 = tpu.concatenate %117, %120 in 0 : vector<1x128xf32>, vector<1x128xf32> -> vector<2x128xf32>
    %c8 = arith.constant 8 : index
    %c0_50 = arith.constant 0 : index
    %122 = vector.load %arg2[%c8, %c0_50] : memref<136x128xf32, #tpu.memory_space<vmem>>, vector<128x128xf32>
    %cst_51 = arith.constant dense<0.000000e+00> : vector<2x128xf32>
    %123 = tpu.matmul %121, %122, %cst_51 {dimension_numbers = #tpu.dot_dimension_numbers<[1], [0], [0], [1], [0, 0, 1, 1], [], []>} : vector<2x128xf32>, vector<128x128xf32>, vector<2x128xf32> -> vector<2x128xf32>
    %cst_52 = arith.constant 6.250000e-04 : f32
    %124 = vector.broadcast %cst_52 : f32 to vector<2x128xf32>
    %125 = arith.mulf %123, %124 : vector<2x128xf32>
    %c5 = arith.constant 5 : index
    %c0_53 = arith.constant 0 : index
    %126 = vector.load %arg2[%c5, %c0_53] : memref<136x128xf32, #tpu.memory_space<vmem>>, vector<1x128xf32>
    %127 = vector.broadcast %126 : vector<1x128xf32> to vector<2x128xf32>
    %128 = arith.addf %125, %127 : vector<2x128xf32>
    %cst_54 = arith.constant 0.000000e+00 : f32
    %129 = vector.broadcast %cst_54 : f32 to vector<6x128xf32>
    %130 = tpu.concatenate %128, %129 in 0 : vector<2x128xf32>, vector<6x128xf32> -> vector<8x128xf32>
    %c0_55 = arith.constant 0 : index
    %c0_56 = arith.constant 0 : index
    %131 = vector.load %arg3[%c0_55, %c0_56] : memref<8x128xf32, #tpu.memory_space<vmem>>, vector<8x128xf32>
    tpu.vector_store %arg3[%c0_55, %c0_56], %130 {strides = array<i32>} : memref<8x128xf32, #tpu.memory_space<vmem>>, vector<8x128xf32>,
    return
  }
}

</mosaic_0001>

<bundles_post_ra>
// kernel: _fwd.1
= control target key start
LH: loop header
LB: loop body
LE: loop exit
PB: predicated region body
PF: predicated region fallthrough
CT: control target
= control target key end

     0   :  { %8 = vsyncpa [#allocation4], 0  ;;  %s1771_s15 = smov [#allocation3]   ;;  %s1772_s17 = smov 128   ;;  %s2154_s0 = inlined_call_operand.vmem [shape: f32[32,128], index: 0, kind: input, shape index: {}]   ;;  %s2155_s1 = inlined_call_operand.vmem [shape: bf16[1664,128], index: 1, kind: input, shape index: {}]   ;;  %s2156_s2 = inlined_call_operand.hbm [shape: f32[136,128], index: 2, kind: input, shape index: {}]   ;;  %s2157_s3 = inlined_call_operand.vmem [shape: f32[8,128], index: 3, kind: output, shape index: {}]  }
   0x1   :  { %s17_s14 = sshll.u32 %s2156_s2, 4  ;;  %s19_s16 = sshll.u32 %s1771_s15, 4  ;;  %s18_s14 = int_to_ptr.hbm [resolvable:$true] %s17_s14  ;;  %s20_s16 = int_to_ptr.vmem [resolvable:$true] %s19_s16 }
   0x2   :  { %s1773_s18 = smov 8  }
   0x3   :  { %25 = dma.hbm_to_vmem [thread:$0]  %s18_s14, 2176, %s20_s16, [#allocation4], %s1772_s17, %s1772_s17, %s1773_s18  }
   0x4   :  { %1769 = dma.done.wait [#allocation4], 2176  }
   0x5   :  { %1770 = vsyncadd [#allocation4], 4294965120  ;;  %v1638_v0 = vld [vmem:[%s2155_s1 + $0x38] sm:$0xff]  ;;  %v1637_v3 = vld [vmem:[%s2155_s1 + $0x30] sm:$0xff]  ;;  %v37_v15 = vlaneseq  ;;  %vm1114_vm14 = vcmask 1043456   ;;  %vm1132_vm15 = vcmask 1040384  }
   0x6   :  { %v1646_v1 = vld [vmem:[%s2155_s1 + $0x78] sm:$0xff]  ;;  %254 = vmatpush.bf16.msra.mxu0 %v1638_v0  ;;  %v1645_v4 = vld [vmem:[%s2155_s1 + $0x70] sm:$0xff]  ;;  %v1636_v6 = vld [vmem:[%s2155_s1 + $0x28] sm:$0xff] }
   0x7   :  { %v1654_v2 = vld [vmem:[%s2155_s1 + $0xb8] sm:$0xff]  ;;  %268 = vmatpush.bf16.msra.mxu1 %v1646_v1  ;;  %v1653_v5 = vld [vmem:[%s2155_s1 + $0xb0] sm:$0xff]  ;;  %v1644_v7 = vld [vmem:[%s2155_s1 + $0x68] sm:$0xff]  ;;  %v1857_v21 = vshrl.u32 %v37_v15, 7 }
   0x8   :  { %282 = vmatpush.bf16.msra.mxu2 %v1654_v2  ;;  %v1652_v8 = vld [vmem:[%s2155_s1 + $0xa8] sm:$0xff]  ;;  %v1635_v9 = vld [vmem:[%s2155_s1 + $0x20] sm:$0xff]  ;;  %v1634_v12 = vld [vmem:[%s2155_s1 + $0x18] sm:$0xff] }
   0x9   :  { %v1643_v10 = vld [vmem:[%s2155_s1 + $0x60] sm:$0xff]  ;;  %v1642_v13 = vld [vmem:[%s2155_s1 + $0x58] sm:$0xff]  ;;  %v1633_v16 = vld [vmem:[%s2155_s1 + $0x10] sm:$0xff]  ;;  %v39_v27 = vadd.s32 8, %v1857_v21  ;;  %vm48_vm0 = vcmp.lt.s32.totalorder %v1857_v21, 1  ;;  %vm40_vm1 = vcmp.eq.s32.totalorder %v1857_v21, 0 }
   0xa   :  { %255 = vmatpush.bf16.msra.mxu0 %v1637_v3  ;;  %v1651_v11 = vld [vmem:[%s2155_s1 + $0xa0] sm:$0xff]  ;;  %v1650_v14 = vld [vmem:[%s2155_s1 + $0x98] sm:$0xff]  ;;  %v1641_v17 = vld [vmem:[%s2155_s1 + $0x50] sm:$0xff]  ;;  %vm303_vm5 = vcmp.eq.s32.totalorder %v1857_v21, 4  ;;  %vm629_vm9 = vcmp.eq.s32.totalorder %v1857_v21, 3  ;;  %vm630_vm10 = vcmp.eq.s32.totalorder %v1857_v21, 7 }
   0xb   :  { %269 = vmatpush.bf16.msra.mxu1 %v1645_v4  ;;  %v1649_v18 = vld [vmem:[%s2155_s1 + $0x90] sm:$0xff]  ;;  %v1183_v19 = vld [vmem:[%s2154_s0 + $0x1] ss:$2 sm:$0xff]  ;;  %v30_v32 = vld [vmem:[%s2154_s0] ss:$2 sm:$0xff]  ;;  %vm1735_vm2 = vcmp.ne.s32.totalorder %v39_v27, 8 }
   0xc   :  { %283 = vmatpush.bf16.msra.mxu2 %v1653_v5  ;;  %v1184_v20 = vld [vmem:[%s2154_s0 + $0x11] ss:$2 sm:$0xff]  ;;  %v1632_v22 = vld [vmem:[%s2155_s1 + $0x8] sm:$0xff]  ;;  %v46_v24 = vrot.slane %v1183_v19, 7  ;;  %v1631_v28 = vld [vmem:[%s2155_s1] sm:$0xff] }
   0xd   :  { %v1640_v23 = vld [vmem:[%s2155_s1 + $0x48] sm:$0xff]  ;;  %v47_v25 = vrot.slane %v1184_v20, 7  ;;  %v1639_v29 = vld [vmem:[%s2155_s1 + $0x40] sm:$0xff]  ;;  %v1182_v33 = vld [vmem:[%s2154_s0 + $0x10] ss:$2 sm:$0xff]  ;;  %v59_v39 = vpack.c.bf16 %v1184_v20, %v1183_v19 }
   0xe   :  { %256 = vmatpush.bf16.msra.mxu0 %v1636_v6  ;;  %v1648_v26 = vld [vmem:[%s2155_s1 + $0x88] sm:$0xff]  ;;  %v1647_v34 = vld [vmem:[%s2155_s1 + $0x80] sm:$0xff]  ;;  %vm1282_vm3 = vmneg %vm40_vm1  ;;  %v58_v38 = vpack.c.bf16 %v1182_v33, %v30_v32 }
   0xf   :  { %270 = vmatpush.bf16.msra.mxu1 %v1644_v7  ;;  %v49_v30 = vsel %vm48_vm0, %v46_v24, %v47_v25  ;;  %v50_v31 = vsel %vm48_vm0, %v47_v25, %v46_v24  ;;  %v1670_v35 = vld [vmem:[%s2155_s1 + $0x138] sm:$0xff]  ;;  %vm1283_vm4 = vmpackc.low %vm1735_vm2, %vm1282_vm3  ;;  %v1669_v41 = vld [vmem:[%s2155_s1 + $0x130] sm:$0xff]  ;;  %vm1174_vm0 = vcmask 1041408  }
  0x10   :  { %284 = vmatpush.bf16.msra.mxu2 %v1652_v8  ;;  %v1678_v36 = vld [vmem:[%s2155_s1 + $0x178] sm:$0xff]  ;;  %v1284_v37 = vpack.c.bf16 %v49_v30, %v50_v31  ;;  %v1677_v42 = vld [vmem:[%s2155_s1 + $0x170] sm:$0xff]  ;;  %v1668_v44 = vld [vmem:[%s2155_s1 + $0x128] sm:$0xff] }
  0x11   :  { %v1662_v40 = vld [vmem:[%s2155_s1 + $0xf8] sm:$0xff]  ;;  %v1661_v43 = vld [vmem:[%s2155_s1 + $0xf0] sm:$0xff]  ;;  %v1676_v45 = vld [vmem:[%s2155_s1 + $0x168] sm:$0xff] }
  0x12   :  { %257 = vmatpush.bf16.msra.mxu0 %v1635_v9  ;;  %506 = vmatpush.bf16.msra.mxu3 %v1662_v40  ;;  %v1660_v46 = vld [vmem:[%s2155_s1 + $0xe8] sm:$0xff]  ;;  %v1667_v47 = vld [vmem:[%s2155_s1 + $0x120] sm:$0xff]  ;;  %v1666_v50 = vld [vmem:[%s2155_s1 + $0x118] sm:$0xff] }
  0x13   :  { %271 = vmatpush.bf16.msra.mxu1 %v1643_v10  ;;  %v1675_v48 = vld [vmem:[%s2155_s1 + $0x160] sm:$0xff]  ;;  %v1674_v51 = vld [vmem:[%s2155_s1 + $0x158] sm:$0xff]  ;;  %v1665_v53 = vld [vmem:[%s2155_s1 + $0x110] sm:$0xff] }
  0x14   :  { %285 = vmatpush.bf16.msra.mxu2 %v1651_v11  ;;  %v1659_v49 = vld [vmem:[%s2155_s1 + $0xe0] sm:$0xff]  ;;  %v1658_v52 = vld [vmem:[%s2155_s1 + $0xd8] sm:$0xff]  ;;  %v1673_v54 = vld [vmem:[%s2155_s1 + $0x150] sm:$0xff] }
  0x15   :  { %v1657_v55 = vld [vmem:[%s2155_s1 + $0xd0] sm:$0xff]  ;;  %v1664_v56 = vld [vmem:[%s2155_s1 + $0x108] sm:$0xff]  ;;  %v1663_v59 = vld [vmem:[%s2155_s1 + $0x100] sm:$0xff] }
  0x16   :  { %258 = vmatpush.bf16.msra.mxu0 %v1634_v12  ;;  %507 = vmatpush.bf16.msra.mxu3 %v1661_v43  ;;  %v1672_v57 = vld [vmem:[%s2155_s1 + $0x148] sm:$0xff]  ;;  %v1671_v60 = vld [vmem:[%s2155_s1 + $0x140] sm:$0xff]  ;;  %v1739_v62 = vld [vmem:[#allocation3] ss:$0 sm:$0xff] }
  0x17   :  { %272 = vmatpush.bf16.msra.mxu1 %v1642_v13  ;;  %v1656_v58 = vld [vmem:[%s2155_s1 + $0xc8] sm:$0xff]  ;;  %v1655_v61 = vld [vmem:[%s2155_s1 + $0xc0] sm:$0xff]  ;;  %v1686_v0 = vld [vmem:[%s2155_s1 + $0x1b8] sm:$0xff] }
  0x18   :  { %286 = vmatpush.bf16.msra.mxu2 %v1650_v14  ;;  %v1685_v2 = vld [vmem:[%s2155_s1 + $0x1b0] sm:$0xff]  ;;  %v1684_v5 = vld [vmem:[%s2155_s1 + $0x1a8] sm:$0xff]  ;;  %vm304_vm6 = vmor %vm40_vm1, %vm303_vm5 }
  0x19   :  { %vm1382_vm7 = vmneg %vm304_vm6  ;;  %v1683_v24 = vld [vmem:[%s2155_s1 + $0x1a0] sm:$0xff]  ;;  %v1682_v25 = vld [vmem:[%s2155_s1 + $0x198] sm:$0xff] }
  0x1a   :  { %259 = vmatpush.bf16.msra.mxu0 %v1633_v16  ;;  %508 = vmatpush.bf16.msra.mxu3 %v1660_v46  ;;  %vm1972_vm8 = vmpackc.low %vm1382_vm7, %vm1382_vm7  ;;  %v1680_v27 = vld [vmem:[%s2155_s1 + $0x188] sm:$0xff]  ;;  %v1694_v30 = vld [vmem:[%s2155_s1 + $0x1f8] sm:$0xff] }
  0x1b   :  { %273 = vmatpush.bf16.msra.mxu1 %v1641_v17  ;;  %v1710_v31 = vld [vmem:[%s2155_s1 + $0x278] sm:$0xff]  ;;  %v1701_v32 = vld [vmem:[%s2155_s1 + $0x230] sm:$0xff]  ;;  %v1707_v40 = vld [vmem:[%s2155_s1 + $0x260] sm:$0xff] }
  0x1c   :  { %287 = vmatpush.bf16.msra.mxu2 %v1649_v18  ;;  %v1693_v33 = vld [vmem:[%s2155_s1 + $0x1f0] sm:$0xff]  ;;  %v1698_v43 = vld [vmem:[%s2155_s1 + $0x218] sm:$0xff]  ;;  %vm631_vm11 = vmor %vm629_vm9, %vm630_vm10 }
  0x1d   :  { %v1740_v46 = vld [vmem:[#allocation3 + $0x1] ss:$0 sm:$0xff]  ;;  %vm1520_vm12 = vmneg %vm631_vm11  ;;  %v1723_v21 = vld [vmem:[%s2155_s1 + $0x2e0] sm:$0xff] }
  0x1e   :  { %260 = vmatpush.bf16.msra.mxu0 %v1632_v22  ;;  %509 = vmatpush.bf16.msra.mxu3 %v1659_v49  ;;  %v1705_v49 = vld [vmem:[%s2155_s1 + $0x250] sm:$0xff]  ;;  %vm2094_vm13 = vmpackc.low %vm1520_vm12, %vm1520_vm12 }
  0x1f   :  { %274 = vmatpush.bf16.msra.mxu1 %v1640_v23  ;;  %v1141_v22 = vld [vmem:[#allocation3 + $0x40] sm:$0xff] }
  0x20   :  { %288 = vmatpush.bf16.msra.mxu2 %v1648_v26  ;;  %v1681_v26 = vld [vmem:[%s2155_s1 + $0x190] sm:$0xff] }
  0x22   :  { %261 = vmatpush.bf16.msra.mxu0 %v1631_v28  ;;  %510 = vmatpush.bf16.msra.mxu3 %v1658_v52  ;;  %v1679_v28 = vld [vmem:[%s2155_s1 + $0x180] sm:$0xff] }
  0x23   :  { %275 = vmatpush.bf16.msra.mxu1 %v1639_v29  ;;  %v1702_v29 = vld [vmem:[%s2155_s1 + $0x238] sm:$0xff] }
  0x24   :  { %289 = vmatpush.bf16.msra.mxu2 %v1647_v34  ;;  %v1709_v34 = vld [vmem:[%s2155_s1 + $0x270] sm:$0xff] }
  0x25   :  { %1285 = vmatmul.msk.bf16.vlgmr.msra.gmra.mxu0 %vm1283_vm4, %v1284_v37  ;;  %v1708_v37 = vld [vmem:[%s2155_s1 + $0x268] sm:$0xff] }
  0x26   :  { %519 = vmatpush.bf16.msrb.mxu0 %v1670_v35  ;;  %276 = vmatmul.bf16.vlgmr.msra.gmra.mxu1 %v58_v38  ;;  %v1700_v35 = vld [vmem:[%s2155_s1 + $0x228] sm:$0xff]  ;;  %v1699_v38 = vld [vmem:[%s2155_s1 + $0x220] sm:$0xff] }
  0x27   :  { %532 = vmatpush.bf16.msrb.mxu1 %v1678_v36  ;;  %290 = vmatmul.bf16.vlgmr.msra.gmra.mxu2 %v59_v39  ;;  %v1692_v36 = vld [vmem:[%s2155_s1 + $0x1e8] sm:$0xff]  ;;  %v1691_v39 = vld [vmem:[%s2155_s1 + $0x1e0] sm:$0xff] }
  0x28   :  { %511 = vmatpush.bf16.msra.mxu3 %v1657_v55  ;;  %613 = vmatpush.bf16.msrb.mxu2 %v1686_v0  ;;  %v1703_v0 = vld [vmem:[%s2155_s1 + $0x240] sm:$0xff] }
  0x2a   :  { %520 = vmatpush.bf16.msrb.mxu0 %v1669_v41 }
  0x2b   :  { %533 = vmatpush.bf16.msrb.mxu1 %v1677_v42 }
  0x2c   :  { %512 = vmatpush.bf16.msra.mxu3 %v1656_v58  ;;  %614 = vmatpush.bf16.msrb.mxu2 %v1685_v2  ;;  %v1718_v2 = vld [vmem:[%s2155_s1 + $0x2b8] sm:$0xff] }
  0x2e   :  { %521 = vmatpush.bf16.msrb.mxu0 %v1668_v44  ;;  %v1690_v44 = vld [vmem:[%s2155_s1 + $0x1d8] sm:$0xff] }
  0x2f   :  { %534 = vmatpush.bf16.msrb.mxu1 %v1676_v45  ;;  %v1706_v45 = vld [vmem:[%s2155_s1 + $0x258] sm:$0xff] }
  0x30   :  { %513 = vmatpush.bf16.msra.mxu3 %v1655_v61  ;;  %615 = vmatpush.bf16.msrb.mxu2 %v1684_v5  ;;  %v1704_v61 = vld [vmem:[%s2155_s1 + $0x248] sm:$0xff]  ;;  %v1717_v5 = vld [vmem:[%s2155_s1 + $0x2b0] sm:$0xff] }
  0x32   :  { %522 = vmatpush.bf16.msrb.mxu0 %v1667_v47  ;;  %v1697_v47 = vld [vmem:[%s2155_s1 + $0x210] sm:$0xff] }
  0x33   :  { %535 = vmatpush.bf16.msrb.mxu1 %v1675_v48  ;;  %v1689_v48 = vld [vmem:[%s2155_s1 + $0x1d0] sm:$0xff] }
  0x34   :  { %616 = vmatpush.bf16.msrb.mxu2 %v1683_v24  ;;  %833 = vmatpush.bf16.msrb.mxu3 %v1694_v30  ;;  %v1731_v24 = vld [vmem:[%s2155_s1 + $0x320] sm:$0xff]  ;;  %v1729_v30 = vld [vmem:[%s2155_s1 + $0x310] sm:$0xff] }
  0x36   :  { %523 = vmatpush.bf16.msrb.mxu0 %v1666_v50 }
  0x37   :  { %536 = vmatpush.bf16.msrb.mxu1 %v1674_v51 }
  0x38   :  { %617 = vmatpush.bf16.msrb.mxu2 %v1682_v25  ;;  %834 = vmatpush.bf16.msrb.mxu3 %v1693_v33  ;;  %v1722_v25 = vld [vmem:[%s2155_s1 + $0x2d8] sm:$0xff]  ;;  %v1728_v33 = vld [vmem:[%s2155_s1 + $0x308] sm:$0xff] }
  0x3a   :  { %524 = vmatpush.bf16.msrb.mxu0 %v1665_v53 }
  0x3b   :  { %537 = vmatpush.bf16.msrb.mxu1 %v1673_v54 }
  0x3c   :  { %618 = vmatpush.bf16.msrb.mxu2 %v1681_v26  ;;  %835 = vmatpush.bf16.msrb.mxu3 %v1692_v36  ;;  %v1714_v26 = vld [vmem:[%s2155_s1 + $0x298] sm:$0xff]  ;;  %v1727_v36 = vld [vmem:[%s2155_s1 + $0x300] sm:$0xff] }
  0x3e   :  { %525 = vmatpush.bf16.msrb.mxu0 %v1664_v56 }
  0x3f   :  { %538 = vmatpush.bf16.msrb.mxu1 %v1672_v57 }
  0x40   :  { %619 = vmatpush.bf16.msrb.mxu2 %v1680_v27  ;;  %836 = vmatpush.bf16.msrb.mxu3 %v1691_v39  ;;  %v1730_v27 = vld [vmem:[%s2155_s1 + $0x318] sm:$0xff]  ;;  %v1742_v39 = vld [vmem:[#allocation3 + $0x3] ss:$0 sm:$0xff] }
  0x42   :  { %526 = vmatpush.bf16.msrb.mxu0 %v1663_v59  ;;  %v1696_v59 = vld [vmem:[%s2155_s1 + $0x208] sm:$0xff] }
  0x43   :  { %539 = vmatpush.bf16.msrb.mxu1 %v1671_v60  ;;  %v1688_v60 = vld [vmem:[%s2155_s1 + $0x1c8] sm:$0xff] }
  0x44   :  { %620 = vmatpush.bf16.msrb.mxu2 %v1679_v28  ;;  %837 = vmatpush.bf16.msrb.mxu3 %v1690_v44  ;;  %v1721_v28 = vld [vmem:[%s2155_s1 + $0x2d0] sm:$0xff] }
  0x46   :  { %846 = vmatpush.bf16.msra.mxu0 %v1702_v29  ;;  %v1713_v29 = vld [vmem:[%s2155_s1 + $0x290] sm:$0xff] }
  0x47   :  { %859 = vmatpush.bf16.msra.mxu1 %v1710_v31  ;;  %v1720_v31 = vld [vmem:[%s2155_s1 + $0x2c8] sm:$0xff] }
  0x48   :  { %838 = vmatpush.bf16.msrb.mxu3 %v1689_v48  ;;  %1074 = vmatpush.bf16.msra.mxu2 %v1718_v2  ;;  %v1135_v2 = vld [vmem:[#allocation3 + $0x10] sm:$0xff] }
  0x4a   :  { %847 = vmatpush.bf16.msra.mxu0 %v1701_v32  ;;  %v1712_v32 = vld [vmem:[%s2155_s1 + $0x288] sm:$0xff] }
  0x4b   :  { %860 = vmatpush.bf16.msra.mxu1 %v1709_v34  ;;  %v1719_v34 = vld [vmem:[%s2155_s1 + $0x2c0] sm:$0xff] }
  0x4c   :  { %839 = vmatpush.bf16.msrb.mxu3 %v1688_v60  ;;  %1075 = vmatpush.bf16.msra.mxu2 %v1717_v5  ;;  %v1142_v60 = vld [vmem:[#allocation3 + $0x48] sm:$0xff]  ;;  %v1743_v5 = vld [vmem:[#allocation3 + $0x4] ss:$0 sm:$0xff] }
  0x4e   :  { %848 = vmatpush.bf16.msra.mxu0 %v1700_v35  ;;  %v1711_v35 = vld [vmem:[%s2155_s1 + $0x280] sm:$0xff] }
  0x4f   :  { %861 = vmatpush.bf16.msra.mxu1 %v1708_v37 }
  0x52   :  { %849 = vmatpush.bf16.msra.mxu0 %v1699_v38 }
  0x53   :  { %862 = vmatpush.bf16.msra.mxu1 %v1707_v40 }
  0x56   :  { %850 = vmatpush.bf16.msra.mxu0 %v1698_v43 }
  0x57   :  { %863 = vmatpush.bf16.msra.mxu1 %v1706_v45 }
  0x5a   :  { %851 = vmatpush.bf16.msra.mxu0 %v1697_v47 }
  0x5b   :  { %864 = vmatpush.bf16.msra.mxu1 %v1705_v49 }
  0x5e   :  { %852 = vmatpush.bf16.msra.mxu0 %v1696_v59  ;;  %v1143_v59 = vld [vmem:[#allocation3 + $0x50] sm:$0xff] }
  0x5f   :  { %865 = vmatpush.bf16.msra.mxu1 %v1704_v61  ;;  %v1140_v61 = vld [vmem:[#allocation3 + $0x38] sm:$0xff] }
  0x63   :  { %866 = vmatpush.bf16.msra.mxu1 %v1703_v0  ;;  %v1137_v0 = vld [vmem:[#allocation3 + $0x20] sm:$0xff] }
  0xa2   :  { %v263_v63 = vpop.f32.mrf.mxu0 }
  0xa3   :  { %v264_v1 = vadd.f32 %v1739_v62, %v263_v63  ;;  %v277_v3 = vpop.f32.mrf.mxu1  ;;  %v1687_v63 = vld [vmem:[%s2155_s1 + $0x1c0] sm:$0xff] }
  0xa4   :  { %840 = vmatpush.bf16.msrb.mxu3 %v1687_v63  ;;  %v1138_v63 = vld [vmem:[#allocation3 + $0x28] sm:$0xff] }
  0xa5   :  { %v278_v4 = vadd.f32 %v277_v3, %v264_v1  ;;  %v1726_v1 = vld [vmem:[%s2155_s1 + $0x2f8] sm:$0xff] }
  0xa6   :  { %v1734_v3 = vld [vmem:[%s2155_s1 + $0x338] sm:$0xff] }
  0xaa   :  { %v291_v6 = vpop.f32.mrf.mxu2  ;;  %v265_v8 = vpop.f32.mrf.mxu0 }
  0xab   :  { %v292_v7 = vadd.f32 %v291_v6, %v278_v4  ;;  %v266_v10 = vadd.f32 %v1739_v62, %v265_v8  ;;  %v279_v11 = vpop.f32.mrf.mxu1  ;;  %v1695_v62 = vld [vmem:[%s2155_s1 + $0x200] sm:$0xff]  ;;  %v1725_v4 = vld [vmem:[%s2155_s1 + $0x2f0] sm:$0xff]  ;;  %v1716_v8 = vld [vmem:[%s2155_s1 + $0x2a8] sm:$0xff] }
  0xac   :  { %853 = vmatpush.bf16.msra.mxu0 %v1695_v62  ;;  %v1733_v6 = vld [vmem:[%s2155_s1 + $0x330] sm:$0xff]  ;;  %1076 = vmatpush.bf16.msra.mxu2 %v1716_v8  ;;  %v1139_v62 = vld [vmem:[#allocation3 + $0x30] sm:$0xff] }
  0xad   :  { %v296_v9 = vmax.f32 %v292_v7, 0.0  ;;  %v280_v12 = vadd.f32 %v279_v11, %v266_v10  ;;  %v1724_v7 = vld [vmem:[%s2155_s1 + $0x2e8] sm:$0xff]  ;;  %v1741_v10 = vld [vmem:[#allocation3 + $0x2] ss:$0 sm:$0xff] }
  0xaf   :  { %298 = vst [vmem:[#allocation2] sm:$0xff] %v296_v9  ;;  %v1732_v9 = vld [vmem:[%s2155_s1 + $0x328] sm:$0xff] }
  0xb2   :  { %v293_v13 = vpop.f32.mrf.mxu2 }
  0xb3   :  { %v294_v14 = vadd.f32 %v293_v13, %v280_v12 }
  0xb5   :  { %v297_v15 = vmax.f32 %v294_v14, 0.0 }
  0xb7   :  { %299 = vst [vmem:[#allocation2 + $0x8] sm:$0xff] %v297_v15 }
  0xbe   :  { %v300_v16 = vld [vmem:[#allocation2] ss:$2 sm:$0xff]  ;;  %v302_v17 = vld [vmem:[#allocation2 + $0x1] ss:$2 sm:$0xff] }
  0xbf   :  { %v310_v18 = vpack.c.bf16 %v300_v16, %v300_v16  ;;  %v311_v19 = vpack.c.bf16 %v302_v17, %v302_v17  ;;  %v305_v20 = vrot.slane %v302_v17, 7 }
  0xc1   :  { %527 = vmatmul.bf16.vlgmr.msrb.gmra.mxu0 %v310_v18  ;;  %540 = vmatmul.bf16.vlgmr.msrb.gmra.mxu1 %v311_v19  ;;  %v1385_v23 = vpack.c.bf16 %v305_v20, %v305_v20 }
  0xc2   :  { %1100 = vmatpush.bf16.msrb.mxu0 %v1734_v3  ;;  %v1134_v3 = vld [vmem:[#allocation3 + $0x8] sm:$0xff] }
  0xc3   :  { %1386 = vmatmul.msk.bf16.vlgmr.msra.gmra.mxu3 %vm1972_vm8, %v1385_v23  ;;  %v1715_v23 = vld [vmem:[%s2155_s1 + $0x2a0] sm:$0xff] }
  0xc4   :  { %1087 = vmatpush.bf16.msra.mxu3 %v1726_v1  ;;  %1077 = vmatpush.bf16.msra.mxu2 %v1715_v23  ;;  %v1136_v1 = vld [vmem:[#allocation3 + $0x18] sm:$0xff] }
  0xc6   :  { %1101 = vmatpush.bf16.msrb.mxu0 %v1733_v6 }
  0xc8   :  { %1088 = vmatpush.bf16.msra.mxu3 %v1725_v4  ;;  %1078 = vmatpush.bf16.msra.mxu2 %v1714_v26 }
  0xca   :  { %1102 = vmatpush.bf16.msrb.mxu0 %v1732_v9 }
  0xcc   :  { %1089 = vmatpush.bf16.msra.mxu3 %v1724_v7  ;;  %1079 = vmatpush.bf16.msra.mxu2 %v1713_v29 }
  0xce   :  { %1103 = vmatpush.bf16.msrb.mxu0 %v1731_v24 }
  0xd0   :  { %1090 = vmatpush.bf16.msra.mxu3 %v1723_v21  ;;  %1080 = vmatpush.bf16.msra.mxu2 %v1712_v32  ;;  %v1744_v32 = vld [vmem:[#allocation3 + $0x5] ss:$0 sm:$0xff] }
  0xd2   :  { %1104 = vmatpush.bf16.msrb.mxu0 %v1730_v27 }
  0xd4   :  { %1091 = vmatpush.bf16.msra.mxu3 %v1722_v25  ;;  %1081 = vmatpush.bf16.msra.mxu2 %v1711_v35 }
  0xd6   :  { %1105 = vmatpush.bf16.msrb.mxu0 %v1729_v30 }
  0xd8   :  { %1092 = vmatpush.bf16.msra.mxu3 %v1721_v28 }
  0xda   :  { %1106 = vmatpush.bf16.msrb.mxu0 %v1728_v33 }
  0xdc   :  { %1093 = vmatpush.bf16.msra.mxu3 %v1720_v31 }
  0xde   :  { %1107 = vmatpush.bf16.msrb.mxu0 %v1727_v36 }
  0xe0   :  { %1094 = vmatpush.bf16.msra.mxu3 %v1719_v34 }
 0x13e   :  { %v528_v41 = vpop.f32.mrf.mxu0  ;;  %v541_v42 = vpop.f32.mrf.mxu1 }
 0x146   :  { %v515_v50 = vpop.f32.mrf.mxu3  ;;  %v530_v51 = vpop.f32.mrf.mxu0 }
 0x147   :  { %v516_v52 = vadd.f32 %v1740_v46, %v515_v50  ;;  %v543_v53 = vpop.f32.mrf.mxu1 }
 0x148   :  { %v1149_v53 = vld [vmem:[#allocation3 + $0x80] sm:$0xff] }
 0x149   :  { %v529_v54 = vadd.f32 %v528_v41, %v516_v52  ;;  %1150 = vmatpush.msrb.mxu1 %v1149_v53 }
 0x14b   :  { %v542_v55 = vadd.f32 %v541_v42, %v529_v54  ;;  %v1148_v54 = vld [vmem:[#allocation3 + $0x78] sm:$0xff] }
 0x14c   :  { %1151 = vmatpush.msrb.mxu1 %v1148_v54 }
 0x14d   :  { %v545_v56 = vmax.f32 %v542_v55, 0.0  ;;  %v1147_v55 = vld [vmem:[#allocation3 + $0x70] sm:$0xff] }
 0x14e   :  { %v517_v57 = vpop.f32.mrf.mxu3  ;;  %1152 = vmatpush.msrb.mxu1 %v1147_v55 }
 0x14f   :  { %v546_v58 = vpack.c.bf16 %v545_v56, %v545_v56  ;;  %v1146_v56 = vld [vmem:[#allocation3 + $0x68] sm:$0xff]  ;;  %v1145_v57 = vld [vmem:[#allocation3 + $0x60] sm:$0xff] }
 0x150   :  { %1153 = vmatpush.msrb.mxu1 %v1146_v56 }
 0x151   :  { %621 = vmatmul.bf16.vlgmr.msrb.gmra.mxu2 %v546_v58  ;;  %v1144_v58 = vld [vmem:[#allocation3 + $0x58] sm:$0xff] }
 0x152   :  { %1154 = vmatpush.msrb.mxu1 %v1145_v57 }
 0x154   :  { %1155 = vmatpush.msrb.mxu1 %v1144_v58 }
 0x156   :  { %1156 = vmatpush.msrb.mxu1 %v1143_v59 }
 0x158   :  { %1157 = vmatpush.msrb.mxu1 %v1142_v60 }
 0x15a   :  { %1158 = vmatpush.msrb.mxu1 %v1141_v22 }
 0x15c   :  { %1159 = vmatpush.msrb.mxu1 %v1140_v61 }
 0x15e   :  { %1160 = vmatpush.msrb.mxu1 %v1139_v62 }
 0x160   :  { %1161 = vmatpush.msrb.mxu1 %v1138_v63 }
 0x162   :  { %1162 = vmatpush.msrb.mxu1 %v1137_v0 }
 0x164   :  { %1163 = vmatpush.msrb.mxu1 %v1136_v1 }
 0x166   :  { %1164 = vmatpush.msrb.mxu1 %v1135_v2 }
 0x168   :  { %1165 = vmatpush.msrb.mxu1 %v1134_v3 }
 0x1d4   :  { %v622_v11 = vpop.f32.mrf.mxu2 }
 0x1d5   :  { %v623_v12 = vadd.f32 %v1741_v10, %v622_v11 }
 0x1d7   :  { %v626_v13 = vmax.f32 %v623_v12, 0.0 }
 0x1d9   :  { %v627_v14 = vrot.slane %v626_v13, 7  ;;  %v632_v15 = vrot.slane %v626_v13, 1  ;;  %v637_v16 = vpack.c.bf16 %v626_v13, %v626_v13 }
 0x1db   :  { %v1518_v18 = vpack.c.bf16 %v627_v14, %v627_v14  ;;  %v1523_v19 = vpack.c.bf16 %v632_v15, %v632_v15  ;;  %854 = vmatmul.bf16.vlgmr.msra.gmra.mxu0 %v637_v16 }
 0x1dc   :  { %v624_v20 = vpop.f32.mrf.mxu2 }
 0x1dd   :  { %1519 = vmatmul.msk.bf16.vlgmr.msrb.gmra.mxu3 %vm1972_vm8, %v1518_v18  ;;  %1524 = vmatmul.msk.bf16.vlgmr.msra.gmra.mxu1 %vm2094_vm13, %v1523_v19 }
 0x258   :  { %v855_v37 = vpop.f32.mrf.mxu0 }
 0x25a   :  { %v868_v38 = vpop.f32.mrf.mxu1 }
 0x260   :  { %v842_v40 = vpop.f32.mrf.mxu3  ;;  %v857_v41 = vpop.f32.mrf.mxu0 }
 0x261   :  { %v843_v42 = vadd.f32 %v1742_v39, %v842_v40 }
 0x262   :  { %v870_v43 = vpop.f32.mrf.mxu1 }
 0x263   :  { %v856_v44 = vadd.f32 %v855_v37, %v843_v42 }
 0x265   :  { %v869_v45 = vadd.f32 %v868_v38, %v856_v44 }
 0x267   :  { %v872_v46 = vmax.f32 %v869_v45, 0.0 }
 0x268   :  { %v844_v47 = vpop.f32.mrf.mxu3 }
 0x269   :  { %v873_v48 = vrot.slane %v872_v46, 7  ;;  %v875_v49 = vrot.slane %v872_v46, 1  ;;  %v878_v50 = vpack.c.bf16 %v872_v46, %v872_v46 }
 0x26b   :  { %v1624_v51 = vpack.c.bf16 %v873_v48, %v873_v48  ;;  %v1629_v52 = vpack.c.bf16 %v875_v49, %v875_v49  ;;  %1095 = vmatmul.bf16.vlgmr.msra.gmra.mxu3 %v878_v50 }
 0x26d   :  { %1625 = vmatmul.msk.bf16.vlgmr.msra.gmra.mxu2 %vm1972_vm8, %v1624_v51  ;;  %1630 = vmatmul.msk.bf16.vlgmr.msrb.gmra.mxu0 %vm2094_vm13, %v1629_v52 }
 0x2ea   :  { %v1109_v4 = vpop.f32.mrf.mxu0 }
 0x2ee   :  { %v1096_v6 = vpop.f32.mrf.mxu3 }
 0x2f0   :  { %v1083_v7 = vpop.f32.mrf.mxu2 }
 0x2f1   :  { %v1084_v8 = vadd.f32 %v1743_v5, %v1083_v7 }
 0x2f2   :  { %v1111_v9 = vpop.f32.mrf.mxu0 }
 0x2f3   :  { %v1097_v10 = vadd.f32 %v1096_v6, %v1084_v8 }
 0x2f5   :  { %v1110_v11 = vadd.f32 %v1109_v4, %v1097_v10 }
 0x2f6   :  { %v1098_v12 = vpop.f32.mrf.mxu3 }
 0x2f7   :  { %v1113_v13 = vmax.f32 %v1110_v11, 0.0 }
 0x2f8   :  { %v1085_v14 = vpop.f32.mrf.mxu2 }
 0x2f9   :  { %v1115_v15 = vsel %vm1114_vm14, %v1113_v13, 0.0  ;;  %v1123_v16 = vrot.slane %v1113_v13, 4 }
 0x2fa   :  { %v1116_v17 = vrot.slane %v1115_v15, 4 }
 0x2fb   :  { %v1125_v18 = vsel %vm1114_vm14, %v1123_v16, 0.0 }
 0x2fc   :  { %v1117_v19 = vadd.f32 %v1116_v17, %v1115_v15  ;;  %v1126_v20 = vrot.slane %v1125_v18, 4 }
 0x2fe   :  { %v1118_v21 = vrot.slane %v1117_v19, 2  ;;  %v1127_v23 = vadd.f32 %v1126_v20, %v1125_v18 }
 0x300   :  { %v1119_v24 = vadd.f32 %v1118_v21, %v1117_v19  ;;  %v1128_v25 = vrot.slane %v1127_v23, 2 }
 0x302   :  { %v1120_v26 = vrot.slane %v1119_v24, 1  ;;  %v1129_v27 = vadd.f32 %v1128_v25, %v1127_v23 }
 0x304   :  { %v1130_v28 = vrot.slane %v1129_v27, 1  ;;  %v1121_v29 = vadd.f32 %v1120_v26, %v1119_v24 }
 0x306   :  { %v1131_v30 = vadd.f32 %v1130_v28, %v1129_v27 }
 0x308   :  { %v1133_v31 = vsel %vm1132_vm15, %v1121_v29, %v1131_v30 }
 0x309   :  { %1166 = vmatmul.f32.vlgmr.msrb.gmra.mxu1 %v1133_v31 }
 0x386   :  { %v1167_v33 = vpop.f32.mrf.mxu1 }
 0x387   :  { %v1170_v34 = vmul.f32 0.000625, %v1167_v33 }
 0x389   :  { %v1173_v35 = vadd.f32 %v1744_v32, %v1170_v34 }
 0x38b   :  { %v1175_v36 = vsel %vm1174_vm0, %v1173_v35, 0.0 }
 0x38c   :  { %1176 = vst [vmem:[%s2157_s3] sm:$0xff] %v1175_v36 }
 0x38d   :  { %1181 = vsyncpa [#allocation4], 1 }

</bundles_post_ra>
